<compile_context>
chip_gen: v7x
topology: tpu7x:2x2x1
jax: 0.10.0
libtpu: 0.0.40
codegen_flags: <defaults>
</compile_context>

<pallas_src>
import jax
import jax.numpy as jnp
from jax.experimental import pallas as pl
from jax.experimental.pallas import tpu as pltpu


# Cap on simultaneously outstanding DMAs inside one kernel invocation.
_MAX_OUTSTANDING_DMAS = 16
# Below this many output bytes, jnp.concatenate beats a DMA kernel.
_DEFAULT_MIN_PALLAS_BYTES = 256 * 1024


def _plan_copies(n_rows, col_widths, max_outstanding=_MAX_OUTSTANDING_DMAS):
    """Static plan of HBM->HBM sub-copies.

    Returns a list of tuples
        (input_idx, row_start, row_len, col_start, col_len, dst_col_start)
    describing   in[input_idx][row_start:+row_len, col_start:+col_len]
              -> out[row_start:+row_len, dst_col_start:+col_len]
    All values are static Python ints.
    """
    k = len(col_widths)
    per_input = max(1, max_outstanding // k)
    plan = []
    dst_off = 0
    for i, w in enumerate(col_widths):
        if n_rows > 1:
            # Split along the batch (row) axis.
            chunks = min(per_input, n_rows)
            base, rem = divmod(n_rows, chunks)
            r = 0
            for c in range(chunks):
                rl = base + (1 if c < rem else 0)
                if rl > 0:
                    plan.append((i, r, rl, 0, w, dst_off))
                    r += rl
        else:
            # N == 1: split along the flattened C*H*W axis, boundaries rounded
            # to multiples of 128 elements (lane-friendly, cheap descriptors).
            chunks = max(1, min(per_input, w // 512))
            bounds = [0]
            for c in range(1, chunks):
                b = ((w * c) // chunks // 128) * 128
                bounds.append(max(b, bounds[-1]))
            bounds.append(w)
            for c in range(chunks):
                c0, c1 = bounds[c], bounds[c + 1]
                if c1 > c0:
                    plan.append((i, 0, n_rows, c0, c1 - c0, dst_off + c0))
        dst_off += w
    return plan


def _make_route_kernel(copy_plan, num_inputs):
    """Kernel that DMA-copies each planned chunk into its output slice."""

    def kernel(*refs):
        # refs = (in_0, ..., in_{k-1}, out, dma_sems)
        in_refs = refs[:num_inputs]
        out_ref = refs[num_inputs]
        sems = refs[num_inputs + 1]

        # Start every HBM->HBM sub-copy first so the DMA engines overlap.
        copies = []
        for sem_idx, (i, r0, rl, c0, cl, d0) in enumerate(copy_plan):
            cp = pltpu.make_async_copy(
                in_refs[i].at[r0:r0 + rl, c0:c0 + cl],
                out_ref.at[r0:r0 + rl, d0:d0 + cl],
                sems.at[sem_idx],
            )
            cp.start()
            copies.append(cp)

        # Wait for all copies; the output is fully written on exit.
        for cp in copies:
            cp.wait()

    return kernel


def route(tensors, min_pallas_bytes=_DEFAULT_MIN_PALLAS_BYTES):
    """Pallas implementation of Route: channel-dim concat of NCHW tensors."""
    assert len(tensors) >= 1
    n, _, h, w = tensors[0].shape
    dtype = tensors[0].dtype
    for t in tensors:
        assert t.shape[0] == n and t.shape[2] == h and t.shape[3] == w
        assert t.dtype == dtype

    if len(tensors) == 1:
        return tensors[0]

    cs = tuple(int(t.shape[1]) for t in tensors)
    c_total = sum(cs)
    k = len(tensors)

    out_bytes = n * c_total * h * w * jnp.dtype(dtype).itemsize
    if out_bytes < min_pallas_bytes:
        # Tiny copies: launch + per-DMA fixed cost dominate; let XLA do it.
        return jnp.concatenate(tensors, axis=1)

    # Flatten to 2-D so every DMA is a single-stride copy with long
    # contiguous runs (C_i*H*W contiguous elements per batch row).
    col_widths = tuple(c * h * w for c in cs)
    flat_inputs = [t.reshape(n, cw) for t, cw in zip(tensors, col_widths)]

    plan = _plan_copies(n, col_widths)

    # Raw HBM refs on both sides; the kernel does all data movement via DMA.
    hbm_spec = pl.BlockSpec(memory_space=pl.ANY)

    flat_out = pl.pallas_call(
        _make_route_kernel(plan, k),
        out_shape=jax.ShapeDtypeStruct((n, c_total * h * w), dtype),
        in_specs=[hbm_spec] * k,
        out_specs=hbm_spec,
        scratch_shapes=[pltpu.SemaphoreType.DMA((len(plan),))],
        cost_estimate=pl.CostEstimate(
            flops=0, transcendentals=0, bytes_accessed=2 * out_bytes),
    )(*flat_inputs)

    return flat_out.reshape(n, c_total, h, w)


if __name__ == "__main__":
    key = jax.random.PRNGKey(0)
    k1, k2, k3 = jax.random.split(key, 3)

    # Small, deterministic NCHW inputs (typical Route usage: concat feature
    # maps with different channel counts but the same spatial size).
    x1 = jax.random.normal(k1, (2, 4, 16, 16), dtype=jnp.float32)
    x2 = jax.random.normal(k2, (2, 6, 16, 16), dtype=jnp.float32)
    x3 = jax.random.normal(k3, (2, 8, 16, 16), dtype=jnp.float32)

    ref = jnp.concatenate([x1, x2, x3], axis=1)

    # 1) Default path: tiny inputs take the jnp.concatenate fallback.
    out_fallback = jax.block_until_ready(route([x1, x2, x3]))
    assert out_fallback.shape == ref.shape and out_fallback.dtype == ref.dtype
    assert bool(jnp.array_equal(out_fallback, ref)), "fallback path mismatch"

    # 2) Forced Pallas path: exercise the DMA kernel on the same inputs.
    out_pallas = jax.block_until_ready(route([x1, x2, x3], min_pallas_bytes=0))
    assert out_pallas.shape == ref.shape and out_pallas.dtype == ref.dtype
    assert bool(jnp.array_equal(out_pallas, ref)), "pallas path mismatch"

    print("KERNEL_OK")
</pallas_src>

<mosaic_0001>
module attributes {stable_mosaic.version = 11 : i64} {
  func.func @kernel(%arg0: memref<2x1024xf32, #tpu.memory_space<any>>, %arg1: memref<2x1536xf32, #tpu.memory_space<any>>, %arg2: memref<2x2048xf32, #tpu.memory_space<any>>, %arg3: memref<2x4608xf32, #tpu.memory_space<any>>, %arg4: memref<6x!tpu.dma_semaphore, #tpu.memory_space<semaphore_mem>>) attributes {dimension_semantics = [], scalar_prefetch = 0 : i64, scratch_operands = 1 : i64, tpu.core_type = #tpu.core_type<tc>} {
    %c0_i32 = arith.constant 0 : i32
    %c0_i32_0 = arith.constant 0 : i32
    %c0_i32_1 = arith.constant 0 : i32
    %0 = tpu.memref_slice %arg0[%c0_i32_0, %c0_i32_1] : memref<2x1024xf32, #tpu.memory_space<any>> -> memref<1x1024xf32, #tpu.memory_space<any>>
    %c0_i32_2 = arith.constant 0 : i32
    %c0_i32_3 = arith.constant 0 : i32
    %1 = tpu.memref_slice %arg3[%c0_i32_2, %c0_i32_3] : memref<2x4608xf32, #tpu.memory_space<any>> -> memref<1x1024xf32, #tpu.memory_space<any>>
    %2 = tpu.memref_slice %arg4[%c0_i32] : memref<6x!tpu.dma_semaphore, #tpu.memory_space<semaphore_mem>> -> memref<1x!tpu.dma_semaphore, #tpu.memory_space<semaphore_mem>>
    %3 = tpu.memref_squeeze %2 : memref<1x!tpu.dma_semaphore, #tpu.memory_space<semaphore_mem>> -> memref<!tpu.dma_semaphore, #tpu.memory_space<semaphore_mem>>
    tpu.enqueue_dma source(%0 : memref<1x1024xf32, #tpu.memory_space<any>>) target(%1 : memref<1x1024xf32, #tpu.memory_space<any>>) target_semaphore(%3 : memref<!tpu.dma_semaphore, #tpu.memory_space<semaphore_mem>>)
    %c1_i32 = arith.constant 1 : i32
    %c1_i32_4 = arith.constant 1 : i32
    %c0_i32_5 = arith.constant 0 : i32
    %4 = tpu.memref_slice %arg0[%c1_i32_4, %c0_i32_5] : memref<2x1024xf32, #tpu.memory_space<any>> -> memref<1x1024xf32, #tpu.memory_space<any>>
    %c1_i32_6 = arith.constant 1 : i32
    %c0_i32_7 = arith.constant 0 : i32
    %5 = tpu.memref_slice %arg3[%c1_i32_6, %c0_i32_7] : memref<2x4608xf32, #tpu.memory_space<any>> -> memref<1x1024xf32, #tpu.memory_space<any>>
    %6 = tpu.memref_slice %arg4[%c1_i32] : memref<6x!tpu.dma_semaphore, #tpu.memory_space<semaphore_mem>> -> memref<1x!tpu.dma_semaphore, #tpu.memory_space<semaphore_mem>>
    %7 = tpu.memref_squeeze %6 : memref<1x!tpu.dma_semaphore, #tpu.memory_space<semaphore_mem>> -> memref<!tpu.dma_semaphore, #tpu.memory_space<semaphore_mem>>
    tpu.enqueue_dma source(%4 : memref<1x1024xf32, #tpu.memory_space<any>>) target(%5 : memref<1x1024xf32, #tpu.memory_space<any>>) target_semaphore(%7 : memref<!tpu.dma_semaphore, #tpu.memory_space<semaphore_mem>>)
    %c2_i32 = arith.constant 2 : i32
    %c0_i32_8 = arith.constant 0 : i32
    %c0_i32_9 = arith.constant 0 : i32
    %8 = tpu.memref_slice %arg1[%c0_i32_8, %c0_i32_9] : memref<2x1536xf32, #tpu.memory_space<any>> -> memref<1x1536xf32, #tpu.memory_space<any>>
    %c0_i32_10 = arith.constant 0 : i32
    %c1024_i32 = arith.constant 1024 : i32
    %9 = tpu.memref_slice %arg3[%c0_i32_10, %c1024_i32] : memref<2x4608xf32, #tpu.memory_space<any>> -> memref<1x1536xf32, #tpu.memory_space<any>>
    %10 = tpu.memref_slice %arg4[%c2_i32] : memref<6x!tpu.dma_semaphore, #tpu.memory_space<semaphore_mem>> -> memref<1x!tpu.dma_semaphore, #tpu.memory_space<semaphore_mem>>
    %11 = tpu.memref_squeeze %10 : memref<1x!tpu.dma_semaphore, #tpu.memory_space<semaphore_mem>> -> memref<!tpu.dma_semaphore, #tpu.memory_space<semaphore_mem>>
    tpu.enqueue_dma source(%8 : memref<1x1536xf32, #tpu.memory_space<any>>) target(%9 : memref<1x1536xf32, #tpu.memory_space<any>>) target_semaphore(%11 : memref<!tpu.dma_semaphore, #tpu.memory_space<semaphore_mem>>)
    %c3_i32 = arith.constant 3 : i32
    %c1_i32_11 = arith.constant 1 : i32
    %c0_i32_12 = arith.constant 0 : i32
    %12 = tpu.memref_slice %arg1[%c1_i32_11, %c0_i32_12] : memref<2x1536xf32, #tpu.memory_space<any>> -> memref<1x1536xf32, #tpu.memory_space<any>>
    %c1_i32_13 = arith.constant 1 : i32
    %c1024_i32_14 = arith.constant 1024 : i32
    %13 = tpu.memref_slice %arg3[%c1_i32_13, %c1024_i32_14] : memref<2x4608xf32, #tpu.memory_space<any>> -> memref<1x1536xf32, #tpu.memory_space<any>>
    %14 = tpu.memref_slice %arg4[%c3_i32] : memref<6x!tpu.dma_semaphore, #tpu.memory_space<semaphore_mem>> -> memref<1x!tpu.dma_semaphore, #tpu.memory_space<semaphore_mem>>
    %15 = tpu.memref_squeeze %14 : memref<1x!tpu.dma_semaphore, #tpu.memory_space<semaphore_mem>> -> memref<!tpu.dma_semaphore, #tpu.memory_space<semaphore_mem>>
    tpu.enqueue_dma source(%12 : memref<1x1536xf32, #tpu.memory_space<any>>) target(%13 : memref<1x1536xf32, #tpu.memory_space<any>>) target_semaphore(%15 : memref<!tpu.dma_semaphore, #tpu.memory_space<semaphore_mem>>)
    %c4_i32 = arith.constant 4 : i32
    %c0_i32_15 = arith.constant 0 : i32
    %c0_i32_16 = arith.constant 0 : i32
    %16 = tpu.memref_slice %arg2[%c0_i32_15, %c0_i32_16] : memref<2x2048xf32, #tpu.memory_space<any>> -> memref<1x2048xf32, #tpu.memory_space<any>>
    %c0_i32_17 = arith.constant 0 : i32
    %c2560_i32 = arith.constant 2560 : i32
    %17 = tpu.memref_slice %arg3[%c0_i32_17, %c2560_i32] : memref<2x4608xf32, #tpu.memory_space<any>> -> memref<1x2048xf32, #tpu.memory_space<any>>
    %18 = tpu.memref_slice %arg4[%c4_i32] : memref<6x!tpu.dma_semaphore, #tpu.memory_space<semaphore_mem>> -> memref<1x!tpu.dma_semaphore, #tpu.memory_space<semaphore_mem>>
    %19 = tpu.memref_squeeze %18 : memref<1x!tpu.dma_semaphore, #tpu.memory_space<semaphore_mem>> -> memref<!tpu.dma_semaphore, #tpu.memory_space<semaphore_mem>>
    tpu.enqueue_dma source(%16 : memref<1x2048xf32, #tpu.memory_space<any>>) target(%17 : memref<1x2048xf32, #tpu.memory_space<any>>) target_semaphore(%19 : memref<!tpu.dma_semaphore, #tpu.memory_space<semaphore_mem>>)
    %c5_i32 = arith.constant 5 : i32
    %c1_i32_18 = arith.constant 1 : i32
    %c0_i32_19 = arith.constant 0 : i32
    %20 = tpu.memref_slice %arg2[%c1_i32_18, %c0_i32_19] : memref<2x2048xf32, #tpu.memory_space<any>> -> memref<1x2048xf32, #tpu.memory_space<any>>
    %c1_i32_20 = arith.constant 1 : i32
    %c2560_i32_21 = arith.constant 2560 : i32
    %21 = tpu.memref_slice %arg3[%c1_i32_20, %c2560_i32_21] : memref<2x4608xf32, #tpu.memory_space<any>> -> memref<1x2048xf32, #tpu.memory_space<any>>
    %22 = tpu.memref_slice %arg4[%c5_i32] : memref<6x!tpu.dma_semaphore, #tpu.memory_space<semaphore_mem>> -> memref<1x!tpu.dma_semaphore, #tpu.memory_space<semaphore_mem>>
    %23 = tpu.memref_squeeze %22 : memref<1x!tpu.dma_semaphore, #tpu.memory_space<semaphore_mem>> -> memref<!tpu.dma_semaphore, #tpu.memory_space<semaphore_mem>>
    tpu.enqueue_dma source(%20 : memref<1x2048xf32, #tpu.memory_space<any>>) target(%21 : memref<1x2048xf32, #tpu.memory_space<any>>) target_semaphore(%23 : memref<!tpu.dma_semaphore, #tpu.memory_space<semaphore_mem>>)
    %c0_i32_22 = arith.constant 0 : i32
    %c0_i32_23 = arith.constant 0 : i32
    %c0_i32_24 = arith.constant 0 : i32
    %24 = tpu.memref_slice %arg0[%c0_i32_23, %c0_i32_24] : memref<2x1024xf32, #tpu.memory_space<any>> -> memref<1x1024xf32, #tpu.memory_space<any>>
    %c0_i32_25 = arith.constant 0 : i32
    %c0_i32_26 = arith.constant 0 : i32
    %25 = tpu.memref_slice %arg3[%c0_i32_25, %c0_i32_26] : memref<2x4608xf32, #tpu.memory_space<any>> -> memref<1x1024xf32, #tpu.memory_space<any>>
    %26 = tpu.memref_slice %arg4[%c0_i32_22] : memref<6x!tpu.dma_semaphore, #tpu.memory_space<semaphore_mem>> -> memref<1x!tpu.dma_semaphore, #tpu.memory_space<semaphore_mem>>
    %27 = tpu.memref_squeeze %26 : memref<1x!tpu.dma_semaphore, #tpu.memory_space<semaphore_mem>> -> memref<!tpu.dma_semaphore, #tpu.memory_space<semaphore_mem>>
    tpu.wait_dma2 semaphore(%27 : memref<!tpu.dma_semaphore, #tpu.memory_space<semaphore_mem>>) src(%24 : memref<1x1024xf32, #tpu.memory_space<any>>) dst(%25 : memref<1x1024xf32, #tpu.memory_space<any>>)
    %c1_i32_27 = arith.constant 1 : i32
    %c1_i32_28 = arith.constant 1 : i32
    %c0_i32_29 = arith.constant 0 : i32
    %28 = tpu.memref_slice %arg0[%c1_i32_28, %c0_i32_29] : memref<2x1024xf32, #tpu.memory_space<any>> -> memref<1x1024xf32, #tpu.memory_space<any>>
    %c1_i32_30 = arith.constant 1 : i32
    %c0_i32_31 = arith.constant 0 : i32
    %29 = tpu.memref_slice %arg3[%c1_i32_30, %c0_i32_31] : memref<2x4608xf32, #tpu.memory_space<any>> -> memref<1x1024xf32, #tpu.memory_space<any>>
    %30 = tpu.memref_slice %arg4[%c1_i32_27] : memref<6x!tpu.dma_semaphore, #tpu.memory_space<semaphore_mem>> -> memref<1x!tpu.dma_semaphore, #tpu.memory_space<semaphore_mem>>
    %31 = tpu.memref_squeeze %30 : memref<1x!tpu.dma_semaphore, #tpu.memory_space<semaphore_mem>> -> memref<!tpu.dma_semaphore, #tpu.memory_space<semaphore_mem>>
    tpu.wait_dma2 semaphore(%31 : memref<!tpu.dma_semaphore, #tpu.memory_space<semaphore_mem>>) src(%28 : memref<1x1024xf32, #tpu.memory_space<any>>) dst(%29 : memref<1x1024xf32, #tpu.memory_space<any>>)
    %c2_i32_32 = arith.constant 2 : i32
    %c0_i32_33 = arith.constant 0 : i32
    %c0_i32_34 = arith.constant 0 : i32
    %32 = tpu.memref_slice %arg1[%c0_i32_33, %c0_i32_34] : memref<2x1536xf32, #tpu.memory_space<any>> -> memref<1x1536xf32, #tpu.memory_space<any>>
    %c0_i32_35 = arith.constant 0 : i32
    %c1024_i32_36 = arith.constant 1024 : i32
    %33 = tpu.memref_slice %arg3[%c0_i32_35, %c1024_i32_36] : memref<2x4608xf32, #tpu.memory_space<any>> -> memref<1x1536xf32, #tpu.memory_space<any>>
    %34 = tpu.memref_slice %arg4[%c2_i32_32] : memref<6x!tpu.dma_semaphore, #tpu.memory_space<semaphore_mem>> -> memref<1x!tpu.dma_semaphore, #tpu.memory_space<semaphore_mem>>
    %35 = tpu.memref_squeeze %34 : memref<1x!tpu.dma_semaphore, #tpu.memory_space<semaphore_mem>> -> memref<!tpu.dma_semaphore, #tpu.memory_space<semaphore_mem>>
    tpu.wait_dma2 semaphore(%35 : memref<!tpu.dma_semaphore, #tpu.memory_space<semaphore_mem>>) src(%32 : memref<1x1536xf32, #tpu.memory_space<any>>) dst(%33 : memref<1x1536xf32, #tpu.memory_space<any>>)
    %c3_i32_37 = arith.constant 3 : i32
    %c1_i32_38 = arith.constant 1 : i32
    %c0_i32_39 = arith.constant 0 : i32
    %36 = tpu.memref_slice %arg1[%c1_i32_38, %c0_i32_39] : memref<2x1536xf32, #tpu.memory_space<any>> -> memref<1x1536xf32, #tpu.memory_space<any>>
    %c1_i32_40 = arith.constant 1 : i32
    %c1024_i32_41 = arith.constant 1024 : i32
    %37 = tpu.memref_slice %arg3[%c1_i32_40, %c1024_i32_41] : memref<2x4608xf32, #tpu.memory_space<any>> -> memref<1x1536xf32, #tpu.memory_space<any>>
    %38 = tpu.memref_slice %arg4[%c3_i32_37] : memref<6x!tpu.dma_semaphore, #tpu.memory_space<semaphore_mem>> -> memref<1x!tpu.dma_semaphore, #tpu.memory_space<semaphore_mem>>
    %39 = tpu.memref_squeeze %38 : memref<1x!tpu.dma_semaphore, #tpu.memory_space<semaphore_mem>> -> memref<!tpu.dma_semaphore, #tpu.memory_space<semaphore_mem>>
    tpu.wait_dma2 semaphore(%39 : memref<!tpu.dma_semaphore, #tpu.memory_space<semaphore_mem>>) src(%36 : memref<1x1536xf32, #tpu.memory_space<any>>) dst(%37 : memref<1x1536xf32, #tpu.memory_space<any>>)
    %c4_i32_42 = arith.constant 4 : i32
    %c0_i32_43 = arith.constant 0 : i32
    %c0_i32_44 = arith.constant 0 : i32
    %40 = tpu.memref_slice %arg2[%c0_i32_43, %c0_i32_44] : memref<2x2048xf32, #tpu.memory_space<any>> -> memref<1x2048xf32, #tpu.memory_space<any>>
    %c0_i32_45 = arith.constant 0 : i32
    %c2560_i32_46 = arith.constant 2560 : i32
    %41 = tpu.memref_slice %arg3[%c0_i32_45, %c2560_i32_46] : memref<2x4608xf32, #tpu.memory_space<any>> -> memref<1x2048xf32, #tpu.memory_space<any>>
    %42 = tpu.memref_slice %arg4[%c4_i32_42] : memref<6x!tpu.dma_semaphore, #tpu.memory_space<semaphore_mem>> -> memref<1x!tpu.dma_semaphore, #tpu.memory_space<semaphore_mem>>
    %43 = tpu.memref_squeeze %42 : memref<1x!tpu.dma_semaphore, #tpu.memory_space<semaphore_mem>> -> memref<!tpu.dma_semaphore, #tpu.memory_space<semaphore_mem>>
    tpu.wait_dma2 semaphore(%43 : memref<!tpu.dma_semaphore, #tpu.memory_space<semaphore_mem>>) src(%40 : memref<1x2048xf32, #tpu.memory_space<any>>) dst(%41 : memref<1x2048xf32, #tpu.memory_space<any>>)
    %c5_i32_47 = arith.constant 5 : i32
    %c1_i32_48 = arith.constant 1 : i32
    %c0_i32_49 = arith.constant 0 : i32
    %44 = tpu.memref_slice %arg2[%c1_i32_48, %c0_i32_49] : memref<2x2048xf32, #tpu.memory_space<any>> -> memref<1x2048xf32, #tpu.memory_space<any>>
    %c1_i32_50 = arith.constant 1 : i32
    %c2560_i32_51 = arith.constant 2560 : i32
    %45 = tpu.memref_slice %arg3[%c1_i32_50, %c2560_i32_51] : memref<2x4608xf32, #tpu.memory_space<any>> -> memref<1x2048xf32, #tpu.memory_space<any>>
    %46 = tpu.memref_slice %arg4[%c5_i32_47] : memref<6x!tpu.dma_semaphore, #tpu.memory_space<semaphore_mem>> -> memref<1x!tpu.dma_semaphore, #tpu.memory_space<semaphore_mem>>
    %47 = tpu.memref_squeeze %46 : memref<1x!tpu.dma_semaphore, #tpu.memory_space<semaphore_mem>> -> memref<!tpu.dma_semaphore, #tpu.memory_space<semaphore_mem>>
    tpu.wait_dma2 semaphore(%47 : memref<!tpu.dma_semaphore, #tpu.memory_space<semaphore_mem>>) src(%44 : memref<1x2048xf32, #tpu.memory_space<any>>) dst(%45 : memref<1x2048xf32, #tpu.memory_space<any>>)
    return
  }
}

</mosaic_0001>

<bundles_post_ra>
// kernel: tpu_custom_call.1
= control target key start
LH: loop header
LB: loop body
LE: loop exit
PB: predicated region body
PF: predicated region fallthrough
CT: control target
= control target key end

     0   :  { %s224_s12 = smov 32   ;;  %s225_s13 = smov 1   ;;  %s319_s0 = inlined_call_operand.hbm [shape: f32[2,1024], index: 0, kind: input, shape index: {}]   ;;  %s320_s1 = inlined_call_operand.hbm [shape: f32[2,1536], index: 1, kind: input, shape index: {}]   ;;  %s321_s2 = inlined_call_operand.hbm [shape: f32[2,2048], index: 2, kind: input, shape index: {}]   ;;  %s322_s3 = inlined_call_operand.hbm [shape: f32[2,4608], index: 3, kind: output, shape index: {}]  }
   0x1   :  { %20 = sst [smem:[#allocation4]] %s224_s12  ;;  %s226_s14 = smov [#allocation2]  }
   0x2   :  { %22 = sst [smem:[#allocation4 + $0x1]] %s224_s12  ;;  %s227_s15 = smov [#allocation3]  }
   0x3   :  { %24 = sst [smem:[#allocation4 + $0x2]] %s225_s13  ;;  %s228_s16 = smov 0  }
   0x4   :  { %26 = dma.general %s319_s0, 128, %s322_s3, %s226_s14, %s227_s15, [#allocation4], %s228_s16, 0  }
   0x5   :  { %42 = sst [smem:[#allocation6]] %s224_s12  ;;  %s27_s23 = scalar_lea.hbm %s319_s0, 16 }
   0x6   :  { %44 = sst [smem:[#allocation6 + $0x1]] %s224_s12  ;;  %s28_s26 = scalar_lea.hbm %s322_s3, 16 }
   0x7   :  { %46 = sst [smem:[#allocation6 + $0x2]] %s225_s13  ;;  %s49_s29 = scalar_lea.hbm %s322_s3, 256 }
   0x8   :  { %s229_s30 = smov [#allocation2 + $0x1]   ;;  %s230_s4 = smov [#allocation5]  }
   0x9   :  { %48 = dma.general %s27_s23, 128, %s28_s26, %s229_s30, %s230_s4, [#allocation6], %s228_s16, 0  }
   0xa   :  { %63 = sst [smem:[#allocation8]] %s224_s12  ;;  %s70_s6 = scalar_lea.hbm %s320_s1, 16 }
   0xb   :  { %65 = sst [smem:[#allocation8 + $0x1]] %s224_s12  ;;  %s231_s7 = smov [#allocation2 + $0x2]  }
   0xc   :  { %67 = sst [smem:[#allocation8 + $0x2]] %s225_s13  ;;  %s232_s8 = smov [#allocation7]  }
   0xd   :  { %69 = dma.general %s320_s1, 192, %s49_s29, %s231_s7, %s232_s8, [#allocation8], %s228_s16, 0  }
   0xe   :  { %85 = sst [smem:[#allocation10]] %s224_s12  ;;  %s71_s15 = scalar_lea.hbm %s322_s3, 272 }
   0xf   :  { %87 = sst [smem:[#allocation10 + $0x1]] %s224_s12  ;;  %s233_s17 = smov [#allocation2 + $0x3]  }
  0x10   :  { %89 = sst [smem:[#allocation10 + $0x2]] %s225_s13  ;;  %s234_s18 = smov [#allocation9]  }
  0x11   :  { %91 = dma.general %s70_s6, 192, %s71_s15, %s233_s17, %s234_s18, [#allocation10], %s228_s16, 0  }
  0x12   :  { %106 = sst [smem:[#allocation12]] %s224_s12  ;;  %s92_s1 = scalar_lea.hbm %s322_s3, 640 }
  0x13   :  { %108 = sst [smem:[#allocation12 + $0x1]] %s224_s12  ;;  %s235_s21 = smov [#allocation2 + $0x4]  }
  0x14   :  { %110 = sst [smem:[#allocation12 + $0x2]] %s225_s13  ;;  %s236_s22 = smov [#allocation11]  }
  0x15   :  { %112 = dma.general %s321_s2, 256, %s92_s1, %s235_s21, %s236_s22, [#allocation12], %s228_s16, 0  }
  0x16   :  { %128 = sst [smem:[#allocation14]] %s224_s12  ;;  %s113_s27 = scalar_lea.hbm %s321_s2, 16 }
  0x17   :  { %130 = sst [smem:[#allocation14 + $0x1]] %s224_s12  ;;  %s114_s30 = scalar_lea.hbm %s322_s3, 656 }
  0x18   :  { %132 = sst [smem:[#allocation14 + $0x2]] %s225_s13  ;;  %s237_s4 = smov [#allocation2 + $0x5]  }
  0x19   :  { %s238_s0 = smov [#allocation13]  }
  0x1a   :  { %134 = dma.general %s113_s27, 256, %s114_s30, %s237_s4, %s238_s0, [#allocation14], %s228_s16, 0  }
  0x1b   :  { %212 = dma.done.wait [#allocation2], 128 }
  0x1c   :  { %213 = vsyncadd [#allocation2], 4294967168 }
  0x1d   :  { %214 = dma.done.wait [#allocation2 + $0x1], 128 }
  0x1e   :  { %215 = vsyncadd [#allocation2 + $0x1], 4294967168 }
  0x1f   :  { %216 = dma.done.wait [#allocation2 + $0x2], 192 }
  0x20   :  { %217 = vsyncadd [#allocation2 + $0x2], 4294967104 }
  0x21   :  { %218 = dma.done.wait [#allocation2 + $0x3], 192 }
  0x22   :  { %219 = vsyncadd [#allocation2 + $0x3], 4294967104 }
  0x23   :  { %220 = dma.done.wait [#allocation2 + $0x4], 256 }
  0x24   :  { %221 = vsyncadd [#allocation2 + $0x4], 4294967040 }
  0x25   :  { %222 = dma.done.wait [#allocation2 + $0x5], 256 }
  0x26   :  { %223 = vsyncadd [#allocation2 + $0x5], 4294967040 }
  0x27   :  { %150 = vsyncmov [#allocation2] }
  0x2a   :  { %s151_s2 = vpop.sfrf %150 }
  0x2b   :  { %p191_p0 = scmp.ne.s32.totalorder %s151_s2, 0 }
  0x2d   :  { %155 = shalt.err (%p191_p0)  }
  0x2e   :  { %157 = vsyncmov [#allocation2 + $0x1] }
  0x31   :  { %s158_s3 = vpop.sfrf %157 }
  0x32   :  { %p192_p1 = scmp.ne.s32.totalorder %s158_s3, 0 }
  0x34   :  { %162 = shalt.err (%p192_p1)  }
  0x35   :  { %164 = vsyncmov [#allocation2 + $0x2] }
  0x38   :  { %s165_s12 = vpop.sfrf %164 }
  0x39   :  { %p193_p2 = scmp.ne.s32.totalorder %s165_s12, 0 }
  0x3b   :  { %169 = shalt.err (%p193_p2)  }
  0x3c   :  { %171 = vsyncmov [#allocation2 + $0x3] }
  0x3f   :  { %s172_s13 = vpop.sfrf %171 }
  0x40   :  { %p194_p3 = scmp.ne.s32.totalorder %s172_s13, 0 }
  0x42   :  { %176 = shalt.err (%p194_p3)  }
  0x43   :  { %178 = vsyncmov [#allocation2 + $0x4] }
  0x46   :  { %s179_s16 = vpop.sfrf %178 }
  0x47   :  { %p195_p4 = scmp.ne.s32.totalorder %s179_s16, 0 }
  0x49   :  { %183 = shalt.err (%p195_p4)  }
  0x4a   :  { %185 = vsyncmov [#allocation2 + $0x5] }
  0x4d   :  { %s186_s5 = vpop.sfrf %185 }
  0x4e   :  { %p196_p5 = scmp.ne.s32.totalorder %s186_s5, 0 }
  0x50   :  { %190 = shalt.err (%p196_p5)  }

</bundles_post_ra>
